<compile_context>
chip_gen: v6e
topology: v6e:2x2x1
jax: 0.10.0
libtpu: 0.0.40
codegen_flags: <defaults>
</compile_context>

<pallas_src>
import jax
import jax.numpy as jnp
from jax.experimental import pallas as pl
from jax.experimental.pallas import tpu as pltpu


def _round_up(a, b):
    return ((a + b - 1) // b) * b


def _vmem_capacity_bytes():
    """Best-effort VMEM capacity query with a device_kind-aware fallback."""
    try:
        return int(pltpu.get_tpu_info().vmem_capacity_bytes)
    except Exception:
        pass
    try:
        kind = jax.devices()[0].device_kind.lower()
    except Exception:
        kind = ""
    if "v7" in kind:
        return 64 * 1024 * 1024
    if "v4" in kind or "v5" in kind or "v6" in kind:
        return 128 * 1024 * 1024
    return 64 * 1024 * 1024  # conservative default (covers v7x)


def _choose_tiles(n, m, k, bytes_in, bytes_out, row_align, budget):
    """Pick (row_tile, k_tile) so the pipelined working set fits `budget`."""

    def fits(rt, kt):
        x_blk = rt * kt * bytes_in * 2      # double-buffered x stream (dominant)
        v_blk = kt * k * bytes_in * 2       # V block (k is small -> tiny)
        o_blk = rt * k * bytes_out * 2      # unpadded output block
        acc = rt * k * 4                    # f32 accumulator (worst case)
        return x_blk + v_blk + o_blk + acc <= budget

    n_ceil = _round_up(max(n, 1), row_align)
    rt_cands = sorted(
        {min(_round_up(t, row_align), n_ceil)
         for t in (2048, 1024, 512, 256, 128, 64, 32, 16, 8)},
        reverse=True,
    )
    # Keep each contiguous per-row x chunk above the DMA-efficiency floor.
    k_floor = 512 if bytes_in >= 4 else 1024

    def pick():
        # Pass 1: avoid reduction tiling (k_tile = m) while the row tile stays
        # reasonably large -- keeps x DMAs fully contiguous whole rows.
        for rt in rt_cands:
            if rt >= min(128, n_ceil) and fits(rt, m):
                return rt, m
        # Pass 2: tile the reduction dim; keep the row tile big and k_tile at
        # or above the contiguity floor.
        kt_all = [t for t in (8192, 4096, 2048, 1024, 512, 256, 128) if t < m]
        kt_pref = [t for t in kt_all if t >= k_floor] or kt_all
        for rt in rt_cands:
            for kt in kt_pref:
                if fits(rt, kt):
                    return rt, kt
        # Pass 3: allow k_tile below the floor before giving up.
        for rt in rt_cands:
            for kt in kt_all:
                if fits(rt, kt):
                    return rt, kt
        return row_align, (m if m <= 128 else 128)

    rt, kt = pick()
    # Give the "parallel" row axis at least 2 steps (v7x has 2 TensorCores and
    # the software pipeline needs >1 step to overlap); never below row_align.
    if n_ceil > row_align:
        two_step = max(row_align, _round_up(-(-n_ceil // 2), row_align))
        rt = min(rt, two_step)
    return rt, kt


def _make_factor_kernel(k_grid, k_tile, m_true, mask_last_k, use_scratch):
    """Build the kernel body for the chosen tiling.

    k_grid == 1          -> single-shot o = x @ V (no accumulator at all).
    use_scratch == False -> accumulate directly into the resident f32 output.
    use_scratch == True  -> accumulate in an f32 VMEM scratch, cast on finalize.
    mask_last_k          -> zero the ragged (>= m_true) columns of x blocks.
    """

    def _load_x(x_ref, kj):
        x = x_ref[...]
        if mask_last_k:
            # Only the last K block is ragged; the compare+select is trivial
            # VPU work in an HBM-bound kernel, so apply it unconditionally.
            col = jax.lax.broadcasted_iota(jnp.int32, x.shape, 1) + kj * k_tile
            x = jnp.where(col < m_true, x, jnp.zeros_like(x))
        return x

    if k_grid == 1:
        def kernel(x_ref, v_ref, o_ref):
            o_ref[...] = jnp.dot(
                x_ref[...], v_ref[...], preferred_element_type=jnp.float32
            ).astype(o_ref.dtype)
        return kernel

    if not use_scratch:
        # f32 output: the resident output block *is* the accumulator.
        def kernel(x_ref, v_ref, o_ref):
            kj = pl.program_id(1)
            contrib = jnp.dot(
                _load_x(x_ref, kj), v_ref[...],
                preferred_element_type=jnp.float32,
            )

            @pl.when(kj == 0)
            def _init():
                o_ref[...] = contrib

            @pl.when(kj > 0)
            def _accumulate():
                o_ref[...] += contrib
        return kernel

    def kernel(x_ref, v_ref, o_ref, acc_ref):
        kj = pl.program_id(1)

        @pl.when(kj == 0)
        def _init():
            acc_ref[...] = jnp.zeros_like(acc_ref)

        acc_ref[...] += jnp.dot(
            _load_x(x_ref, kj), v_ref[...], preferred_element_type=jnp.float32
        )

        @pl.when(kj == pl.num_programs(1) - 1)
        def _finalize():
            o_ref[...] = acc_ref[...].astype(o_ref.dtype)

    return kernel


def _x_block_spec(row_tile, k_tile, deep):
    index_map = lambda i, j: (i, j)
    if deep:
        try:
            return pl.BlockSpec(
                (row_tile, k_tile), index_map,
                pipeline_mode=pl.Buffered(buffer_count=3),
            )
        except Exception:
            pass  # older API: fall back to the default 2-deep pipeline
    return pl.BlockSpec((row_tile, k_tile), index_map)


def factor_layer_forward(x, V, *, row_tile=None, k_tile=None,
                         compute_dtype=None, vmem_limit_bytes=None):
    """Pallas implementation of FactorLayer.forward: x @ V.

    x: (n, m), V: (m, k)  ->  (n, k)

    compute_dtype streams x / V through the MXU in that dtype (e.g. bf16 to
    halve HBM traffic when x is already bf16 or the cast fuses upstream);
    accumulation is always f32 and the output keeps x.dtype, matching
    `torch.mm(x, self.V)` up to the chosen operand precision.
    """
    n, m = x.shape
    m2, k = V.shape
    assert m == m2, "inner dimensions must match"
    assert k <= m, "n_components must not exceed the input feature dimension"

    out_dtype = x.dtype
    compute_dtype = jnp.dtype(x.dtype if compute_dtype is None else compute_dtype)
    bytes_in = compute_dtype.itemsize
    bytes_out = jnp.dtype(out_dtype).itemsize
    # Sublane packing: 8 rows (>=4B), 16 (2B), 32 (1B dtypes).
    row_align = 8 if bytes_in >= 4 else (16 if bytes_in == 2 else 32)

    vmem_cap = _vmem_capacity_bytes()
    if vmem_limit_bytes is None:
        vmem_limit_bytes = int(vmem_cap * 0.85)
    budget = int(vmem_limit_bytes * 0.75)

    auto_rt, auto_kt = _choose_tiles(n, m, k, bytes_in, bytes_out, row_align, budget)
    if row_tile is None:
        row_tile = auto_rt
    if k_tile is None:
        k_tile = auto_kt

    row_tile = max(row_align, _round_up(int(row_tile), row_align))
    k_tile = int(k_tile)
    if k_tile >= m:
        k_tile = m                       # block dim == full array dim: legal
    else:
        k_tile = max(128, _round_up(k_tile, 128))
        if k_tile >= m:
            k_tile = m

    rows_grid = pl.cdiv(n, row_tile)
    k_grid = pl.cdiv(m, k_tile)
    mask_last_k = (k_grid > 1) and (m % k_tile != 0)

    # Never pad / copy x: it streams straight from HBM in its own dtype unless
    # a different compute dtype was explicitly requested.
    x_c = x if x.dtype == compute_dtype else x.astype(compute_dtype)
    V_c = V if V.dtype == compute_dtype else V.astype(compute_dtype)
    # Only V (tiny, m x k) gets padded, and only when the K tile is ragged, so
    # every V block is full and the out-of-bounds contraction terms are zeros
    # (the matching ragged x columns are masked to zero in-kernel).
    if mask_last_k:
        m_ceil = k_grid * k_tile
        V_c = jnp.pad(V_c, ((0, m_ceil - m), (0, 0)))

    use_scratch = (k_grid > 1) and (jnp.dtype(out_dtype) != jnp.dtype(jnp.float32))
    kernel = _make_factor_kernel(k_grid, k_tile, m, mask_last_k, use_scratch)
    scratch_shapes = (
        [pltpu.VMEM((row_tile, k), jnp.float32)] if use_scratch else []
    )

    # Deepen the x pipeline when per-step blocks are small and steps are many
    # (v7x: high HBM BW, 64 MiB VMEM -> per-step overhead otherwise exposed).
    x_block_bytes = row_tile * k_tile * bytes_in
    deep_pipeline = (x_block_bytes < (2 << 20)) and (rows_grid * k_grid >= 8)

    cost = pl.CostEstimate(
        flops=2 * n * m * k,                       # true dims, not padded
        transcendentals=0,
        bytes_accessed=bytes_in * n * m + bytes_in * V_c.size + bytes_out * n * k,
    )

    out = pl.pallas_call(
        kernel,
        out_shape=jax.ShapeDtypeStruct((n, k), out_dtype),
        grid_spec=pltpu.PrefetchScalarGridSpec(
            num_scalar_prefetch=0,
            grid=(rows_grid, k_grid),
            in_specs=[
                _x_block_spec(row_tile, k_tile, deep_pipeline),       # x tile
                pl.BlockSpec((k_tile, k), lambda i, j: (j, 0)),       # V tile
            ],
            out_specs=pl.BlockSpec((row_tile, k), lambda i, j: (i, 0)),
            scratch_shapes=scratch_shapes,
        ),
        compiler_params=pltpu.CompilerParams(
            dimension_semantics=("parallel", "arbitrary"),
            vmem_limit_bytes=int(vmem_limit_bytes),
        ),
        cost_estimate=cost,
    )(x_c, V_c)

    return out


def make_orthogonal(key, rows, cols, dtype=jnp.float32):
    """Deterministic orthogonal init matching torch.nn.init.orthogonal_
    semantics (QR of a standard-normal matrix, columns sign-fixed by diag(R))."""
    a = jax.random.normal(key, (rows, cols), dtype=jnp.float32)
    q, r = jnp.linalg.qr(a)
    d = jnp.sign(jnp.diagonal(r))
    d = jnp.where(d == 0, 1.0, d)
    q = q * d[None, :]
    return q.astype(dtype)


if __name__ == "__main__":
    key = jax.random.PRNGKey(0)
    kx, kv, kx2, kv2 = jax.random.split(key, 4)

    # FactorLayer spec: X (n, m) projected to X @ V (n, k), k << m.
    n, m, k = 16, 32, 8
    x = jax.random.normal(kx, (n, m), dtype=jnp.float32)
    V = make_orthogonal(kv, m, k, dtype=jnp.float32)       # FactorLayer parameter

    out = jax.block_until_ready(factor_layer_forward(x, V))
    ref = x @ V
    assert out.shape == (n, k)
    assert jnp.allclose(out, ref, atol=1e-5, rtol=1e-5), "f32 mismatch vs reference"

    # Ragged shapes: partial trailing row block, K tiling with a ragged last K
    # block (masked in-kernel), accumulation into the resident f32 output.
    n2, m2, k2 = 200, 300, 20
    x2 = jax.random.normal(kx2, (n2, m2), dtype=jnp.float32)
    V2 = make_orthogonal(kv2, m2, k2, dtype=jnp.float32)
    out2 = jax.block_until_ready(
        factor_layer_forward(x2, V2, row_tile=64, k_tile=128)
    )
    ref2 = x2 @ V2
    assert out2.shape == (n2, k2)
    assert jnp.allclose(out2, ref2, atol=1e-4, rtol=1e-4), "tiled mismatch vs reference"

    # bf16 inputs / bf16 output with K tiling: exercises the f32 scratch path.
    x3 = x2.astype(jnp.bfloat16)
    V3 = V2.astype(jnp.bfloat16)
    out3 = jax.block_until_ready(
        factor_layer_forward(x3, V3, row_tile=64, k_tile=128)
    )
    ref3 = (x3.astype(jnp.float32) @ V3.astype(jnp.float32)).astype(jnp.bfloat16)
    assert out3.shape == (n2, k2)
    assert float(jnp.max(jnp.abs(out3.astype(jnp.float32)
                                 - ref3.astype(jnp.float32)))) < 0.1, "bf16 out diverged"

    # bf16 streaming of f32 inputs (f32 accumulation, f32 output); loose check.
    out4 = jax.block_until_ready(
        factor_layer_forward(x, V, compute_dtype=jnp.bfloat16)
    )
    assert out4.shape == (n, k)
    assert float(jnp.max(jnp.abs(out4 - ref))) < 0.5, "bf16 streaming path diverged"

    print("KERNEL_OK")
</pallas_src>

<mosaic_0001>
module attributes {stable_mosaic.version = 11 : i64} {
  func.func @kernel(%arg0: i32, %arg1: i32, %arg2: memref<8x32xf32, #tpu.memory_space<vmem>>, %arg3: memref<32x8xf32, #tpu.memory_space<vmem>>, %arg4: memref<8x8xf32, #tpu.memory_space<vmem>>) attributes {dimension_semantics = [#tpu.dimension_semantics<parallel>, #tpu.dimension_semantics<arbitrary>], iteration_bounds = array<i64: 2, 1>, scalar_prefetch = 0 : i64, scratch_operands = 0 : i64, tpu.core_type = #tpu.core_type<tc>, window_params = [{transform_indices = @transform_0, window_bounds = array<i64: 8, 32>}, {transform_indices = @transform_1, window_bounds = array<i64: 32, 8>}, {transform_indices = @transform_2, window_bounds = array<i64: 8, 8>}]} {
    %c0 = arith.constant 0 : index
    %c0_0 = arith.constant 0 : index
    %0 = vector.load %arg2[%c0, %c0_0] : memref<8x32xf32, #tpu.memory_space<vmem>>, vector<8x32xf32>
    %c0_1 = arith.constant 0 : index
    %c0_2 = arith.constant 0 : index
    %1 = vector.load %arg3[%c0_1, %c0_2] : memref<32x8xf32, #tpu.memory_space<vmem>>, vector<32x8xf32>
    %cst = arith.constant dense<0.000000e+00> : vector<8x8xf32>
    %2 = tpu.matmul %0, %1, %cst {dimension_numbers = #tpu.dot_dimension_numbers<[1], [0], [0], [1], [0, 0, 1, 1], [], []>} : vector<8x32xf32>, vector<32x8xf32>, vector<8x8xf32> -> vector<8x8xf32>
    %c0_3 = arith.constant 0 : index
    %c0_4 = arith.constant 0 : index
    %3 = vector.load %arg4[%c0_3, %c0_4] : memref<8x8xf32, #tpu.memory_space<vmem>>, vector<8x8xf32>
    tpu.vector_store %arg4[%c0_3, %c0_4], %2 {strides = array<i32>} : memref<8x8xf32, #tpu.memory_space<vmem>>, vector<8x8xf32>,
    return
  }
  func.func @transform_0(%arg0: i32, %arg1: i32) -> (i32, i32) {
    %c0_i32 = arith.constant 0 : i32
    return %arg0, %arg1 : i32, i32
  }
  func.func @transform_1(%arg0: i32, %arg1: i32) -> (i32, i32) {
    %c0_i32 = arith.constant 0 : i32
    %c0_i32_0 = arith.constant 0 : i32
    return %arg1, %c0_i32 : i32, i32
  }
  func.func @transform_2(%arg0: i32, %arg1: i32) -> (i32, i32) {
    %c0_i32 = arith.constant 0 : i32
    %c0_i32_0 = arith.constant 0 : i32
    return %arg0, %c0_i32 : i32, i32
  }
}

</mosaic_0001>

<bundles_post_ra>
// kernel: tpu_custom_call.1
= control target key start
LH: loop header
LB: loop body
LE: loop exit
PB: predicated region body
PF: predicated region fallthrough
CT: control target
= control target key end

     0   :  { %s439_s9 = smov 0   ;;  %s441_s10 = smov 0   ;;  %s484_s0 = inlined_call_operand.vmem [shape: f32[16,32], index: 0, kind: input, shape index: {}]   ;;  %s485_s1 = inlined_call_operand.vmem [shape: f32[32,8], index: 1, kind: input, shape index: {}]   ;;  %s486_s2 = inlined_call_operand.vmem [shape: f32[16,8], index: 2, kind: output, shape index: {}]  }
   0x1   :  { %s443_s11 = smov 0  }
   0x2 LB: > { %s24_s12 = sadd.s32 1, %s416_s10  ;;  %p350_p0 = scmp.ge.s32.totalorder %s420_s11, 1  ;;  %s420_s11 = sphi %s443_s11, %s12_s11   ;;  %s416_s10 = sphi %s441_s10, %s488_s10   ;;  %s412_s9 = sphi %s439_s9, %s487_s9  }
   0x3   : > { %p26_p1 = scmp.ge.s32.totalorder %s24_s12, 2  ;;  %p139_p2 = scmp.lt.s32.totalorder %s420_s11, 3 }
   0x5   : > { %s490_s12 = smov (%p26_p1, %s24_s12), 0  ;;  %p140_p3 = pnand %p350_p0, %p139_p2 }
   0x6   : > { %p167_p4 = scmp.lt.s32.totalorder (!%p140_p3), %s412_s9, 1 }
   0x7   : > { %143 = sbr.rel (%p140_p3) target bundleno = 216 (0xd8), region = 28 }
   0xc   : > { %v188_v0 = vld [vmem:[%s485_s1 + $0x18] sm:$0xff]  ;;  %v422_v1 = vmov 0.0   ;;  %v187_v2 = vld [vmem:[%s485_s1 + $0x10] sm:$0xff]  ;;  %vm423_vm0 = vmmov 0   ;;  %s492_s9 = smov (!%p167_p4, %s412_s9), 1  ;;  %v186_v3 = vld [vmem:[%s485_s1 + $0x8] sm:$0xff] }
   0xd   : > { %361 = vmatprep.subr.mxu0 %v422_v1  ;;  %369 = vmatprep.mubr.msk.f32.mxu0 %vm423_vm0, %v422_v1  ;;  %s351_s19 = sshll.u32 %s492_s9, 3  ;;  %v185_v4 = vld [vmem:[%s485_s1] sm:$0xff]  ;;  %vm189_vm1 = vcmask 261120   ;;  %vm263_vm2 = vcmask 64512  }
   0xe   : > { %362 = vmatpush3.msra.mxu0 %v188_v0  ;;  %s173_s24 = scalar_lea.vmem %s484_s0, %s351_s19  ;;  %s183_s27 = scalar_lea.vmem %s486_s2, %s351_s19 }
   0xf   : > { %363 = vmatprep.subr.mxu0 %v422_v1  ;;  %v184_v5 = vld [vmem:[%s173_s24] sm:$0xff] }
  0x10   : > { %364 = vmatpush3.msra.mxu0 %v187_v2 }
  0x11   : > { %365 = vmatprep.subr.mxu0 %v422_v1 }
  0x12   : > { %366 = vmatpush3.msra.mxu0 %v186_v3 }
  0x13   : > { %367 = vmatprep.subr.mxu0 %v422_v1 }
  0x14   : > { %368 = vmatpush3.msra.mxu0 %v185_v4 }
  0x15   : > { %370 = vmatmul.mubr.msk.f32.vlgmr.msra.gmra.mxu0 %vm189_vm1, %v184_v5 }
  0xd5   : > { %v259_v6 = vpop.f32.mrf.mxu0 }
  0xd6   : > { %264 = vst.msk [vmem:[%s183_s27] sm:$0xff] %vm263_vm2, %v259_v6 }
  0xd7   : > { %v371_v7 = vpop.f32.mrf.mxu0 }
  0xd8 PF: > { %s12_s11 = sadd.s32 1, %s420_s11   ;;  %s487_s9 = smov %s416_s10 }
  0xd9   : > { %p9_p5 = scmp.ge.s32.totalorder %s12_s11, 4   ;;  %s488_s10 = smov %s490_s12 }
  0xdb   :  { %11 = sbr.rel (!%p9_p5) target bundleno = 2 (0x2), region = 61 }

</bundles_post_ra>
